<compile_context>
chip_gen: v7x
topology: tpu7x:2x2x1
jax: 0.10.0
libtpu: 0.0.40
codegen_flags: <defaults>
</compile_context>

<pallas_src>
import functools

import jax
import jax.numpy as jnp
import numpy as np
from jax import lax
from jax.experimental import pallas as pl
from jax.experimental.pallas import tpu as pltpu


def _mlp_kernel(x_ref, w1_ref, b1_ref, w2_ref, b2_ref, o_ref):
    x = x_ref[...]      # [TB, W]   batch tile on sublanes, window on lanes
    w1 = w1_ref[...]    # [H, W]    PyTorch layout

    # Layer 1 on the MXU, computed transposed: hT[H, TB] = W1 @ x^T
    # (contract the window dim of both operands -> batch ends up on lanes).
    hT = lax.dot_general(
        w1, x,
        dimension_numbers=(((1,), (1,)), ((), ())),
        preferred_element_type=jnp.float32,
        precision=lax.Precision.HIGHEST,        # true-f32 parity with PyTorch
    )                                           # [H, TB]
    hT = jnp.maximum(hT + b1_ref[...], 0.0)     # bias (lane-broadcast) + ReLU on the VPU

    # Layer 2 (output width 1): VPU multiply + XLU sublane reduce, not an N=1 MXU matmul.
    o = jnp.sum(hT * w2_ref[...], axis=0, keepdims=True)   # [1, TB], lane-dense
    o_ref[...] = (o + b2_ref[0, 0]).astype(o_ref.dtype)    # b2 scalar read from SMEM


def _round_up(x, m):
    return ((x + m - 1) // m) * m


@functools.partial(jax.jit, static_argnames=("block_batch",))
def simple_forecast_forward(x, w1, b1, w2, b2, *, block_batch=4096):
    """x: [batch, window] f32 -> [batch] f32 (matches PyTorch .squeeze(-1)).

    block_batch: batch rows per grid step. Large tiles (2048-8192) amortize the
    ~0.35 us per-grid-step overhead; the tile is clamped so (a) >= 2 grid tiles exist
    whenever batch > 128 (v7x megacore split) and (b) the double-buffered, lane-padded
    x tiles (bb * 512 B each) stay well inside every generation's scoped VMEM default.
    """
    batch, window = x.shape
    hidden = w1.shape[0]

    bb = min(block_batch, 8192, _round_up(pl.cdiv(batch, 2), 128))
    bb = max(bb, 128)
    num_tiles = pl.cdiv(batch, bb)

    flops = 2 * batch * window * hidden + 3 * batch * hidden
    bytes_accessed = 4 * (batch * window + batch + hidden * window + 2 * hidden + 1)

    out = pl.pallas_call(
        _mlp_kernel,
        out_shape=jax.ShapeDtypeStruct((1, batch), jnp.float32),
        grid=(num_tiles,),
        in_specs=[
            pl.BlockSpec((bb, window), lambda i: (i, 0)),        # x: tiled over batch
            pl.BlockSpec((hidden, window), lambda i: (0, 0)),    # w1: VMEM-resident
            pl.BlockSpec((hidden, 1), lambda i: (0, 0)),         # b1 column: resident
            pl.BlockSpec((hidden, 1), lambda i: (0, 0)),         # w2 column: resident
            pl.BlockSpec(memory_space=pltpu.MemorySpace.SMEM),   # b2 scalar in SMEM
        ],
        out_specs=pl.BlockSpec((1, bb), lambda i: (0, i)),       # lane-dense output slab
        compiler_params=pltpu.CompilerParams(
            dimension_semantics=("parallel",),                   # megacore split on v7x
        ),
        cost_estimate=pl.CostEstimate(
            flops=flops, transcendentals=0, bytes_accessed=bytes_accessed),
    )(x, w1, b1, w2, b2)

    return out[0]  # squeeze(-1); out_shape already has the exact batch extent


def init_params(key, window_size, hidden_dim):
    """Deterministic init mimicking PyTorch nn.Linear default U(-1/sqrt(fan_in), +)."""
    k1, k2, k3, k4 = jax.random.split(key, 4)
    bound1 = 1.0 / jnp.sqrt(window_size)
    bound2 = 1.0 / jnp.sqrt(hidden_dim)
    w1 = jax.random.uniform(k1, (hidden_dim, window_size), jnp.float32, -bound1, bound1)
    b1 = jax.random.uniform(k2, (hidden_dim, 1), jnp.float32, -bound1, bound1)
    w2 = jax.random.uniform(k3, (hidden_dim, 1), jnp.float32, -bound2, bound2)
    b2 = jax.random.uniform(k4, (1, 1), jnp.float32, -bound2, bound2)
    return w1, b1, w2, b2


if __name__ == "__main__":
    # Tiny correctness check (NOT a benchmark): with batch=200 the >=2-tile clamp picks
    # bb=128 and exercises the ragged last block + masked output store. Throughput runs
    # should use a large batch with the default block_batch.
    window_size = 8
    hidden_dim = 64      # module default
    batch = 200

    key = jax.random.PRNGKey(0)
    k_x, k_p = jax.random.split(key)
    x = jax.random.normal(k_x, (batch, window_size), dtype=jnp.float32)
    w1, b1, w2, b2 = init_params(k_p, window_size, hidden_dim)

    y = simple_forecast_forward(x, w1, b1, w2, b2)
    y = jax.block_until_ready(y)

    # float64 numpy reference (same math as the PyTorch module).
    xh = np.asarray(x, np.float64)
    w1h = np.asarray(w1, np.float64)
    b1h = np.asarray(b1, np.float64)
    w2h = np.asarray(w2, np.float64)
    b2h = np.asarray(b2, np.float64)
    h_ref = np.maximum(xh @ w1h.T + b1h[:, 0][None, :], 0.0)
    y_ref = (h_ref @ w2h + b2h[0, 0])[:, 0]

    assert y.shape == (batch,)
    assert np.allclose(np.asarray(y, np.float64), y_ref, atol=1e-4, rtol=1e-4)

    print("KERNEL_OK")
</pallas_src>

<mosaic_0001>
module attributes {stable_mosaic.version = 11 : i64} {
  func.func @_mlp_kernel(%arg0: i32, %arg1: memref<128x8xf32, #tpu.memory_space<vmem>>, %arg2: memref<64x8xf32, #tpu.memory_space<vmem>>, %arg3: memref<64x1xf32, #tpu.memory_space<vmem>>, %arg4: memref<64x1xf32, #tpu.memory_space<vmem>>, %arg5: memref<1x1xf32, #tpu.memory_space<smem>>, %arg6: memref<1x128xf32, #tpu.memory_space<vmem>>) attributes {dimension_semantics = [#tpu.dimension_semantics<parallel>], iteration_bounds = array<i64: 2>, scalar_prefetch = 0 : i64, scratch_operands = 0 : i64, tpu.core_type = #tpu.core_type<tc>, window_params = [{transform_indices = @transform_0, window_bounds = array<i64: 128, 8>}, {pipeline_mode = #tpu.pipeline_mode<synchronous>, transform_indices = @transform_1, window_bounds = array<i64: 64, 8>}, {pipeline_mode = #tpu.pipeline_mode<synchronous>, transform_indices = @transform_2, window_bounds = array<i64: 64, 1>}, {pipeline_mode = #tpu.pipeline_mode<synchronous>, transform_indices = @transform_3, window_bounds = array<i64: 64, 1>}, {transform_indices = @transform_4, window_bounds = array<i64: 1, 1>}, {transform_indices = @transform_5, window_bounds = array<i64: 1, 128>}]} {
    %c0 = arith.constant 0 : index
    %c0_0 = arith.constant 0 : index
    %0 = vector.load %arg1[%c0, %c0_0] : memref<128x8xf32, #tpu.memory_space<vmem>>, vector<128x8xf32>
    %c0_1 = arith.constant 0 : index
    %c0_2 = arith.constant 0 : index
    %1 = vector.load %arg2[%c0_1, %c0_2] : memref<64x8xf32, #tpu.memory_space<vmem>>, vector<64x8xf32>
    %cst = arith.constant dense<0.000000e+00> : vector<64x128xf32>
    %2 = tpu.matmul %1, %0, %cst {dimension_numbers = #tpu.dot_dimension_numbers<[1], [1], [0], [0], [0, 0, 1, 0], [], []>, precision = #tpu.contract_precision<fp32>} : vector<64x8xf32>, vector<128x8xf32>, vector<64x128xf32> -> vector<64x128xf32>
    %c0_3 = arith.constant 0 : index
    %c0_4 = arith.constant 0 : index
    %3 = vector.load %arg3[%c0_3, %c0_4] : memref<64x1xf32, #tpu.memory_space<vmem>>, vector<64x1xf32>
    %4 = vector.broadcast %3 : vector<64x1xf32> to vector<64x128xf32>
    %5 = arith.addf %2, %4 : vector<64x128xf32>
    %cst_5 = arith.constant 0.000000e+00 : f32
    %6 = vector.broadcast %cst_5 : f32 to vector<64x128xf32>
    %7 = arith.maximumf %5, %6 : vector<64x128xf32>
    %c0_6 = arith.constant 0 : index
    %c0_7 = arith.constant 0 : index
    %8 = vector.load %arg4[%c0_6, %c0_7] : memref<64x1xf32, #tpu.memory_space<vmem>>, vector<64x1xf32>
    %9 = vector.broadcast %8 : vector<64x1xf32> to vector<64x128xf32>
    %10 = arith.mulf %7, %9 : vector<64x128xf32>
    %cst_8 = arith.constant dense<0.000000e+00> : vector<128xf32>
    %11 = vector.multi_reduction <add>, %10, %cst_8 [0] : vector<64x128xf32> to vector<128xf32>
    %12 = vector.shape_cast %11 : vector<128xf32> to vector<1x128xf32>
    %c0_9 = arith.constant 0 : index
    %c0_10 = arith.constant 0 : index
    %13 = memref.load %arg5[%c0_9, %c0_10] : memref<1x1xf32, #tpu.memory_space<smem>>
    %14 = vector.broadcast %13 : f32 to vector<1x128xf32>
    %15 = arith.addf %12, %14 : vector<1x128xf32>
    %c0_11 = arith.constant 0 : index
    %c0_12 = arith.constant 0 : index
    %16 = vector.load %arg6[%c0_11, %c0_12] : memref<1x128xf32, #tpu.memory_space<vmem>>, vector<1x128xf32>
    tpu.vector_store %arg6[%c0_11, %c0_12], %15 {strides = array<i32>} : memref<1x128xf32, #tpu.memory_space<vmem>>, vector<1x128xf32>,
    return
  }
  func.func @transform_0(%arg0: i32) -> (i32, i32) {
    %c0_i32 = arith.constant 0 : i32
    %c0_i32_0 = arith.constant 0 : i32
    return %arg0, %c0_i32 : i32, i32
  }
  func.func @transform_1(%arg0: i32) -> (i32, i32) {
    %c0_i32 = arith.constant 0 : i32
    %c0_i32_0 = arith.constant 0 : i32
    %c0_i32_1 = arith.constant 0 : i32
    return %c0_i32, %c0_i32_0 : i32, i32
  }
  func.func @transform_2(%arg0: i32) -> (i32, i32) {
    %c0_i32 = arith.constant 0 : i32
    %c0_i32_0 = arith.constant 0 : i32
    %c0_i32_1 = arith.constant 0 : i32
    return %c0_i32, %c0_i32_0 : i32, i32
  }
  func.func @transform_3(%arg0: i32) -> (i32, i32) {
    %c0_i32 = arith.constant 0 : i32
    %c0_i32_0 = arith.constant 0 : i32
    %c0_i32_1 = arith.constant 0 : i32
    return %c0_i32, %c0_i32_0 : i32, i32
  }
  func.func @transform_4(%arg0: i32) -> (i32, i32) {
    %c0_i32 = arith.constant 0 : i32
    %c0_i32_0 = arith.constant 0 : i32
    %c0_i32_1 = arith.constant 0 : i32
    return %c0_i32, %c0_i32_0 : i32, i32
  }
  func.func @transform_5(%arg0: i32) -> (i32, i32) {
    %c0_i32 = arith.constant 0 : i32
    %c0_i32_0 = arith.constant 0 : i32
    return %c0_i32, %arg0 : i32, i32
  }
}

</mosaic_0001>

<bundles_post_ra>
// kernel: simple_forecast_forward.1
= control target key start
LH: loop header
LB: loop body
LE: loop exit
PB: predicated region body
PF: predicated region fallthrough
CT: control target
= control target key end

     0   :  { %s2756_s0 = inlined_call_operand.vmem [shape: f32[200,8], index: 0, kind: input, shape index: {}]   ;;  %s2757_s1 = inlined_call_operand.vmem [shape: f32[64,8], index: 1, kind: input, shape index: {}]   ;;  %s2758_s2 = inlined_call_operand.vmem [shape: f32[64,1], index: 2, kind: input, shape index: {}]   ;;  %s2759_s3 = inlined_call_operand.vmem [shape: f32[64,1], index: 3, kind: input, shape index: {}]   ;;  %s2760_s4 = inlined_call_operand.<no memory space> [shape: f32[1,1], index: 4, kind: input, shape index: {}]   ;;  %s2761_s5 = inlined_call_operand.hbm [shape: f32[1,200], index: 5, kind: output, shape index: {}]  }
   0x1   :  { %10 = sst [smem:[#allocation2]] %s2760_s4 }
   0x2   :  { %11 = vsyncpa [#allocation4], 0 }
   0x3   :  { %13 = vsyncpa [#allocation4 + $0x1], 0  ;;  %s2279_s20 = smov 0   ;;  %s2281_s21 = smov 0  }
   0x4   :  { %s2283_s22 = smov 0   ;;  %s2285_s23 = smov 0  }
   0x5 LB: > { %s1480_s4 = sadd.s32 4294967295, %s2242_s23   ;;  %s1481_s24 = sadd.s32 4294967294, %s2242_s23   ;;  %s2242_s23 = sphi %s2285_s23, %s2790_s23   ;;  %s2238_s22 = sphi %s2283_s22, %s2789_s22   ;;  %s2234_s21 = sphi %s2281_s21, %s2788_s21   ;;  %s2230_s20 = sphi %s2279_s20, %s2787_s20  }
   0x6   : > { %s2302_s25 = sadd.s32 1, %s2242_s23   ;;  %s136_s26 = sadd.s32 1, %s2238_s22 }
   0x7   : > { %s133_s27 = ssub.s32 %s2242_s23, %s2302_s25  ;;  %p146_p0 = scmp.ne.s32.totalorder %s2238_s22, %s2234_s21 }
   0x8   : > { %p134_p1 = scmp.eq.s32.totalorder %s133_s27, 0  ;;  %p147_p2 = scmp.eq.s32.totalorder %s1480_s4, 1 }
   0x9   : > { %p152_p3 = scmp.ne.s32.totalorder %s2234_s21, %s2230_s20  ;;  %p153_p4 = scmp.eq.s32.totalorder %s1481_s24, 1 }
   0xa   : > { %s2312_s28 = scalar_select %p134_p1, %s2238_s22, %s136_s26  }
   0xb   : > { %p2314_p5 = por %p147_p2, %p146_p0  ;;  %p2318_p6 = por %p153_p4, %p152_p3 }
   0xc   : > { %p1484_p7 = scmp.ge.s32.totalorder %s2242_s23, 1  ;;  %p200_p8 = scmp.lt.s32.totalorder %s2242_s23, 3 }
   0xe   : > { %p201_p9 = pnand %p1484_p7, %p200_p8 }
  0x10   : > { %204 = sbr.rel (%p201_p9) target bundleno = 493 (0x1ed), region = 40 }
  0x17   : > { %s2324_s6 = sshll.u32 %s1480_s4, 4  ;;  %vm317_vm0 = vcmask 64512   ;;  %v261_v0 = vld [vmem:[%s2757_s1] sm:$0xff]  ;;  %s2245_s18 = smov [#allocation3]  }
  0x18   : > { %p236_p10 = scmp.lt.s32.totalorder %s2324_s6, 24  ;;  %v319_v1 = vsel %vm317_vm0, %v261_v0, 0  ;;  %s2714_s15 = scalar_lea.hbm %s2761_s5, %s2324_s6 }
  0x19   : > { %v2331_v2 = vand.u32 4294901760, %v319_v1  ;;  %s2184_s19 = sshll.u32 %s2245_s18, 4  ;;  %s2185_s19 = int_to_ptr.vmem [resolvable:$false] %s2184_s19 }
  0x1a   : > { %s237_s9 = scalar_select %p236_p10, %s2324_s6, 24 }
  0x1b   : > { %v2335_v3 = vsub.f32 %v319_v1, %v2331_v2  ;;  %s2186_s4 = scalar_lea.vmem %s2185_s19, 32 }
  0x1c   : > { %s1486_s10 = sshll.u32 %s237_s9, 3  ;;  %s1409_s9 = sld [smem:[#allocation2]] }
  0x1d   : > { %s2340_s13 = scalar_lea.vmem %s2756_s0, %s1486_s10  ;;  %v473_v4 = vand.u32 4294901760, %v2335_v3  ;;  %s229_s10 = sand.u32 1, %s2234_s21  }
  0x1e   : > { %v245_v5 = vld [vmem:[%s2340_s13] sm:$0xff]  ;;  %v246_v6 = vld [vmem:[%s2340_s13 + $0x8] sm:$0xff]  ;;  %v247_v7 = vld [vmem:[%s2340_s13 + $0x10] sm:$0xff]  ;;  %s230_s11 = scalar_lea.vmem [#allocation3], %s229_s10  ;;  %s1414_s16 = scalar_lea.sflag [#allocation4], %s229_s10 }
  0x1f   : > { %v343_v8 = vsel %vm317_vm0, %v245_v5, 0  ;;  %v346_v9 = vsel %vm317_vm0, %v246_v6, 0  ;;  %v248_v10 = vld [vmem:[%s2340_s13 + $0x18] sm:$0xff]  ;;  %v349_v11 = vsel %vm317_vm0, %v247_v7, 0  ;;  %1798 = vmatprep.mubr.f32.mxu0 %v473_v4  ;;  %v249_v16 = vld [vmem:[%s2340_s13 + $0x20] sm:$0xff]  ;;  %v250_v17 = vld [vmem:[%s2340_s13 + $0x28] sm:$0xff]  ;;  %v474_v23 = vsub.f32 %v2335_v3, %v473_v4 }
  0x20   : > { %v391_v12 = vand.u32 4294901760, %v343_v8  ;;  %v394_v13 = vand.u32 4294901760, %v346_v9  ;;  %v352_v14 = vsel %vm317_vm0, %v248_v10, 0  ;;  %v397_v15 = vand.u32 4294901760, %v349_v11  ;;  %v251_v26 = vld [vmem:[%s2340_s13 + $0x30] sm:$0xff]  ;;  %v252_v27 = vld [vmem:[%s2340_s13 + $0x38] sm:$0xff] }
  0x21   : > { %v400_v18 = vand.u32 4294901760, %v352_v14  ;;  %v355_v21 = vsel %vm317_vm0, %v249_v16, 0  ;;  %v358_v22 = vsel %vm317_vm0, %v250_v17, 0  ;;  %v475_v28 = vand.u32 4294901760, %v474_v23  ;;  %v253_v34 = vld [vmem:[%s2340_s13 + $0x40] sm:$0xff]  ;;  %v254_v35 = vld [vmem:[%s2340_s13 + $0x48] sm:$0xff] }
  0x22   : > { %v2353_v19 = vpack.c.bf16 %v394_v13, %v391_v12  ;;  %v403_v24 = vand.u32 4294901760, %v355_v21  ;;  %v406_v25 = vand.u32 4294901760, %v358_v22  ;;  %v361_v30 = vsel %vm317_vm0, %v251_v26, 0  ;;  %v255_v41 = vld [vmem:[%s2340_s13 + $0x50] sm:$0xff]  ;;  %v256_v42 = vld [vmem:[%s2340_s13 + $0x58] sm:$0xff]  ;;  %v257_v55 = vld [vmem:[%s2340_s13 + $0x60] sm:$0xff] }
  0x23   : > { %v2355_v20 = vpack.c.bf16 %v400_v18, %v397_v15  ;;  %1666 = vmatprep.mubr.f32.mxu1 %v475_v28  ;;  %v364_v31 = vsel %vm317_vm0, %v252_v27, 0  ;;  %v409_v32 = vand.u32 4294901760, %v361_v30  ;;  %v367_v37 = vsel %vm317_vm0, %v253_v34, 0  ;;  %v258_v56 = vld [vmem:[%s2340_s13 + $0x68] sm:$0xff]  ;;  %v264_v28 = vld [vmem:[%s2757_s1 + $0x18] sm:$0xff]  ;;  %s1426_s12 = sshll.u32 %s230_s11, 4  ;;  %s2716_s12 = int_to_ptr.vmem [resolvable:$true] %s1426_s12 }
  0x24   : > { %1899 = vmatprep.subr.bf16.mxu1 %v2353_v19  ;;  %1995 = vmatprep.subr.bf16.mxu0 %v2353_v19  ;;  %v2368_v29 = vpack.c.bf16 %v406_v25, %v403_v24  ;;  %v412_v33 = vand.u32 4294901760, %v364_v31  ;;  %v370_v38 = vsel %vm317_vm0, %v254_v35, 0  ;;  %v415_v39 = vand.u32 4294901760, %v367_v37  ;;  %s2180_s17 = scalar_lea.vmem %s2716_s12, 16  ;;  %p2187_p0 = scmp.lt.s32.totalorder %s2716_s12, %s2185_s19 }
  0x25   : > { %1901 = vmatpush3.bf16.xpose.msra.mxu1 %v2353_v19  ;;  %1997 = vmatpush3.bf16.xpose.msra.mxu0 %v2353_v19  ;;  %v418_v40 = vand.u32 4294901760, %v370_v38  ;;  %v373_v44 = vsel %vm317_vm0, %v255_v41, 0  ;;  %v376_v45 = vsel %vm317_vm0, %v256_v42, 0  ;;  %v2394_v46 = vsub.f32 %v343_v8, %v391_v12  ;;  %v260_v12 = vld [vmem:[%s2340_s13 + $0x78] sm:$0xff]  ;;  %p2181_p11 = scmp.ne.s32.totalorder %s2716_s12, %s2180_s17  ;;  %p2188_p1 = scmp.lt.s32.totalorder %s2186_s4, %s2180_s17 }
  0x26   : > { %1903 = vmatprep.subr.bf16.mxu1 %v2355_v20  ;;  %1999 = vmatprep.subr.bf16.mxu0 %v2355_v20  ;;  %v2378_v36 = vpack.c.bf16 %v412_v33, %v409_v32  ;;  %v2396_v47 = vsub.f32 %v346_v9, %v394_v13  ;;  %v421_v48 = vand.u32 4294901760, %v373_v44  ;;  %v424_v49 = vand.u32 4294901760, %v376_v45 }
  0x27   : > { %v2388_v43 = vpack.c.bf16 %v418_v40, %v415_v39  ;;  %v2400_v50 = vsub.f32 %v349_v11, %v397_v15  ;;  %v2402_v51 = vsub.f32 %v352_v14, %v400_v18  ;;  %v2404_v52 = vsub.f32 %v355_v21, %v403_v24  ;;  %v259_v11 = vld [vmem:[%s2340_s13 + $0x70] sm:$0xff]  ;;  %v262_v14 = vld [vmem:[%s2757_s1 + $0x8] sm:$0xff]  ;;  %p2182_p12 = pnand %p2181_p11, %p2314_p5  ;;  %p2189_p2 = por %p2188_p1, %p2187_p0 }
  0x28   : > { %v2406_v53 = vsub.f32 %v358_v22, %v406_v25  ;;  %v2410_v54 = vpack.c.bf16 %v2396_v47, %v2394_v46  ;;  %v2414_v57 = vsub.f32 %v361_v30, %v409_v32  ;;  %v2416_v58 = vsub.f32 %v364_v31, %v412_v33  ;;  %v263_v22 = vld [vmem:[%s2757_s1 + $0x10] sm:$0xff]  ;;  %v265_v30 = vld [vmem:[%s2757_s1 + $0x20] sm:$0xff] }
  0x29   : > { %v2418_v59 = vsub.f32 %v367_v37, %v415_v39  ;;  %v2420_v60 = vsub.f32 %v370_v38, %v418_v40  ;;  %v2424_v61 = vpack.c.bf16 %v2402_v51, %v2400_v50  ;;  %v2430_v63 = vpack.c.bf16 %v424_v49, %v421_v48  ;;  %v266_v39 = vld [vmem:[%s2757_s1 + $0x28] sm:$0xff]  ;;  %p2183_p13 = pneg %p2182_p12 }
  0x2a   : > { %v2428_v62 = vpack.c.bf16 %v2406_v53, %v2404_v52  ;;  %v2434_v0 = vpack.c.bf16 %v2416_v58, %v2414_v57  ;;  %v379_v4 = vsel %vm317_vm0, %v257_v55, 0  ;;  %v382_v5 = vsel %vm317_vm0, %v258_v56, 0 }
  0x2b   : > { %v2438_v1 = vpack.c.bf16 %v2420_v60, %v2418_v59  ;;  %v2442_v6 = vsub.f32 %v373_v44, %v421_v48  ;;  %v2444_v7 = vsub.f32 %v376_v45, %v424_v49  ;;  %v427_v9 = vand.u32 4294901760, %v379_v4  ;;  %v267_v48 = vld [vmem:[%s2757_s1 + $0x30] sm:$0xff]  ;;  %p2190_p3 = pnand %p2189_p2, %p2183_p13 }
  0x2c   : > { %v430_v10 = vand.u32 4294901760, %v382_v5  ;;  %v385_v15 = vsel %vm317_vm0, %v259_v11, 0  ;;  %v388_v16 = vsel %vm317_vm0, %v260_v12, 0  ;;  %v322_v21 = vsel %vm317_vm0, %v262_v14, 0 }
  0x2d   : > { %1905 = vmatpush3.bf16.xpose.msra.mxu1 %v2355_v20  ;;  %2001 = vmatpush3.bf16.xpose.msra.mxu0 %v2355_v20  ;;  %v2450_v8 = vpack.c.bf16 %v2444_v7, %v2442_v6  ;;  %v2463_v17 = vsub.f32 %v379_v4, %v427_v9  ;;  %v433_v24 = vand.u32 4294901760, %v385_v15  ;;  %v436_v25 = vand.u32 4294901760, %v388_v16 }
  0x2e   : > { %1907 = vmatprep.subr.bf16.mxu1 %v2368_v29  ;;  %2003 = vmatprep.subr.bf16.mxu0 %v2368_v29  ;;  %v2456_v13 = vpack.c.bf16 %v430_v10, %v427_v9  ;;  %v2465_v18 = vsub.f32 %v382_v5, %v430_v10  ;;  %v554_v26 = vand.u32 4294901760, %v2394_v46  ;;  %v561_v27 = vand.u32 4294901760, %v2396_v47  ;;  %v268_v9 = vld [vmem:[%s2757_s1 + $0x38] sm:$0xff] }
  0x2f   : > { %v2487_v31 = vand.u32 4294901760, %v322_v21  ;;  %v325_v32 = vsel %vm317_vm0, %v263_v22, 0  ;;  %v328_v33 = vsel %vm317_vm0, %v264_v28, 0  ;;  %v2491_v34 = vpack.c.bf16 %v436_v25, %v433_v24 }
  0x30   : > { %2773 = vst [vmem:[#allocation6_spill] sm:$0xff] %v2456_v13  ;;  %v2475_v23 = vpack.c.bf16 %v2465_v18, %v2463_v17  ;;  %v555_v35 = vsub.f32 %v2394_v46, %v554_v26  ;;  %v562_v37 = vsub.f32 %v2396_v47, %v561_v27  ;;  %v331_v38 = vsel %vm317_vm0, %v265_v30, 0 }
  0x31   : > { %2775 = vst [vmem:[#allocation8_spill] sm:$0xff] %v2491_v34  ;;  %v2499_v40 = vand.u32 4294901760, %v325_v32  ;;  %v2501_v41 = vsub.f32 %v385_v15, %v433_v24  ;;  %v2503_v42 = vsub.f32 %v388_v16, %v436_v25  ;;  %v2506_v44 = vsub.f32 %v322_v21, %v2487_v31 }
  0x32   : > { %2774 = vst [vmem:[#allocation7_spill] sm:$0xff] %v2475_v23  ;;  %v2508_v45 = vand.u32 4294901760, %v328_v33  ;;  %v2512_v46 = vand.u32 4294901760, %v331_v38  ;;  %v334_v47 = vsel %vm317_vm0, %v266_v39, 0  ;;  %v556_v55 = vand.u32 4294901760, %v555_v35 }
  0x33   : > { %2776 = vst [vmem:[#allocation9_spill] sm:$0xff] %v2506_v44  ;;  %v2520_v49 = vpack.c.bf16 %v2503_v42, %v2501_v41  ;;  %v563_v56 = vand.u32 4294901760, %v562_v37  ;;  %v568_v4 = vand.u32 4294901760, %v2400_v50  ;;  %v575_v5 = vand.u32 4294901760, %v2402_v51 }
  0x34   : > { %v2530_v10 = vsub.f32 %v325_v32, %v2499_v40  ;;  %v483_v11 = vand.u32 4294901760, %v2506_v44  ;;  %v2534_v12 = vsub.f32 %v328_v33, %v2508_v45  ;;  %v2536_v14 = vand.u32 4294901760, %v334_v47 }
  0x35   : > { %1909 = vmatpush3.bf16.xpose.msra.mxu1 %v2368_v29  ;;  %2005 = vmatpush3.bf16.xpose.msra.mxu0 %v2368_v29  ;;  %2777 = vst [vmem:[#allocation10_spill] sm:$0xff] %v2520_v49  ;;  %v337_v15 = vsel %vm317_vm0, %v267_v48, 0  ;;  %v2540_v16 = vsub.f32 %v331_v38, %v2512_v46  ;;  %v340_v21 = vsel %vm317_vm0, %v268_v9, 0  ;;  %v1930_v22 = vpack.c.bf16 %v563_v56, %v556_v55 }
  0x36   : > { %1911 = vmatprep.subr.bf16.mxu1 %v2378_v36  ;;  %2007 = vmatprep.subr.bf16.mxu0 %v2378_v36  ;;  %2778 = vst [vmem:[#allocation11_spill] sm:$0xff] %v2530_v10  ;;  %2779 = vst [vmem:[#allocation12_spill] sm:$0xff] %v2534_v12  ;;  %v2026_v24 = vpack.c.bf16 %v561_v27, %v554_v26  ;;  %v569_v25 = vsub.f32 %v2400_v50, %v568_v4  ;;  %v493_v30 = vand.u32 4294901760, %v2530_v10 }
  0x37   : > { %v576_v28 = vsub.f32 %v2402_v51, %v575_v5  ;;  %v2546_v32 = vand.u32 4294901760, %v337_v15  ;;  %v484_v33 = vsub.f32 %v2506_v44, %v483_v11  ;;  %v503_v35 = vand.u32 4294901760, %v2534_v12 }
  0x38   : > { %v2551_v37 = vsub.f32 %v334_v47, %v2536_v14  ;;  %v2553_v38 = vand.u32 4294901760, %v340_v21  ;;  %v513_v50 = vand.u32 4294901760, %v2540_v16  ;;  %v570_v51 = vand.u32 4294901760, %v569_v25 }
  0x39   : > { %v577_v26 = vand.u32 4294901760, %v576_v28  ;;  %v582_v27 = vand.u32 4294901760, %v2404_v52  ;;  %v589_v39 = vand.u32 4294901760, %v2406_v53  ;;  %v494_v48 = vsub.f32 %v2530_v10, %v493_v30 }
  0x3a   : > { %v2562_v47 = vsub.f32 %v337_v15, %v2546_v32  ;;  %v485_v55 = vand.u32 4294901760, %v484_v33  ;;  %v504_v56 = vsub.f32 %v2534_v12, %v503_v35  ;;  %v523_v9 = vand.u32 4294901760, %v2551_v37 }
  0x3b   : > { %v2567_v44 = vsub.f32 %v340_v21, %v2553_v38  ;;  %v514_v25 = vsub.f32 %v2540_v16, %v513_v50  ;;  %v1934_v28 = vpack.c.bf16 %v577_v26, %v570_v51  ;;  %v583_v49 = vsub.f32 %v2404_v52, %v582_v27 }
  0x3c   : > { %v495_v10 = vand.u32 4294901760, %v494_v48  ;;  %v533_v15 = vand.u32 4294901760, %v2562_v47  ;;  %v505_v33 = vand.u32 4294901760, %v504_v56  ;;  %v524_v12 = vsub.f32 %v2551_v37, %v523_v9 }
  0x3d   : > { %1913 = vmatpush3.bf16.xpose.msra.mxu1 %v2378_v36  ;;  %2009 = vmatpush3.bf16.xpose.msra.mxu0 %v2378_v36  ;;  %v543_v23 = vand.u32 4294901760, %v2567_v44  ;;  %v515_v21 = vand.u32 4294901760, %v514_v25  ;;  %v596_v52 = vand.u32 4294901760, %v2414_v57  ;;  %v2244_v56 = vmov 0  }
  0x3e   : > { %1915 = vmatprep.subr.bf16.mxu1 %v2388_v43  ;;  %2011 = vmatprep.subr.bf16.mxu0 %v2388_v43  ;;  %v525_v51 = vand.u32 4294901760, %v524_v12 }
  0x3f   : > { %v544_v26 = vsub.f32 %v2567_v44, %v543_v23  ;;  %2178 = vset.pattern.permute.xlu0 %v2244_v56  ;;  %2179 = vset.pattern.permute.xlu1 %v2244_v56  ;;  %v1346_v56 = vld [vmem:[%s2759_s3 + $0x30] sm:$0xff] }
  0x45   : > { %1917 = vmatpush3.bf16.xpose.msra.mxu1 %v2388_v43  ;;  %2013 = vmatpush3.bf16.xpose.msra.mxu0 %v2388_v43 }
  0x46   : > { %1919 = vmatprep.subr.bf16.mxu1 %v2430_v63  ;;  %2015 = vmatprep.subr.bf16.mxu0 %v2430_v63 }
  0x4d   : > { %1921 = vmatpush3.bf16.xpose.msra.mxu1 %v2430_v63  ;;  %2017 = vmatpush3.bf16.xpose.msra.mxu0 %v2430_v63 }
  0x4e   : > { %1923 = vmatprep.subr.bf16.mxu1 %v2456_v13  ;;  %2019 = vmatprep.subr.bf16.mxu0 %v2456_v13 }
  0x55   : > { %1925 = vmatpush3.bf16.xpose.msra.mxu1 %v2456_v13  ;;  %2021 = vmatpush3.bf16.xpose.msra.mxu0 %v2456_v13  ;;  %v590_v13 = vsub.f32 %v2406_v53, %v589_v39  ;;  %v603_v53 = vand.u32 4294901760, %v2416_v58 }
  0x56   : > { %1927 = vmatprep.subr.bf16.mxu1 %v2491_v34  ;;  %2023 = vmatprep.subr.bf16.mxu0 %v2491_v34 }
  0x5d   : > { %1929 = vmatpush3.bf16.xpose.msra.mxu1 %v2491_v34  ;;  %2025 = vmatpush3.bf16.xpose.msra.mxu0 %v2491_v34  ;;  %v2030_v34 = vpack.c.bf16 %v575_v5, %v568_v4  ;;  %v584_v4 = vand.u32 4294901760, %v583_v49  ;;  %v591_v5 = vand.u32 4294901760, %v590_v13  ;;  %v597_v49 = vsub.f32 %v2414_v57, %v596_v52  ;;  %v269_v57 = vld [vmem:[%s2758_s2] sm:$0xff] }
  0x5e   : > { %1931 = vmatprep.subr.bf16.mxu1 %v1930_v22  ;;  %2027 = vmatprep.subr.bf16.mxu0 %v2026_v24  ;;  %v604_v13 = vsub.f32 %v2416_v58, %v603_v53  ;;  %v271_v58 = vld [vmem:[%s2758_s2 + $0x10] sm:$0xff] }
  0x5f   : > { %279 = vperm.xlu0 %2178, %v269_v57   ;;  %289 = vperm.xlu1 %2179, %v271_v58   ;;  %v1344_v57 = vld [vmem:[%s2759_s3 + $0x20] sm:$0xff]  ;;  %v1345_v58 = vld [vmem:[%s2759_s3 + $0x28] sm:$0xff] }
  0x60   : > { %v605_v12 = vand.u32 4294901760, %v604_v13 }
  0x64   : > { %1667 = vmatmul.mubr.f32.vlgmr.msra.gmra.mrb[0].mxu1 %v485_v55  ;;  %1799 = vmatmul.mubr.f32.vlgmr.msra.gmra.mrb[0].mxu0 %v483_v11  ;;  %v534_v11 = vsub.f32 %v2562_v47, %v533_v15 }
  0x65   : > { %1933 = vmatpush3.bf16.xpose.msra.mxu1 %v1930_v22  ;;  %2029 = vmatpush3.bf16.xpose.msra.mxu0 %v2026_v24  ;;  %v1938_v22 = vpack.c.bf16 %v591_v5, %v584_v4  ;;  %v2034_v24 = vpack.c.bf16 %v589_v39, %v582_v27 }
  0x66   : > { %1935 = vmatprep.subr.bf16.mxu1 %v1934_v28  ;;  %2031 = vmatprep.subr.bf16.mxu0 %v2030_v34  ;;  %v535_v48 = vand.u32 4294901760, %v534_v11  ;;  %v274_v11 = vld [vmem:[%s2758_s2 + $0x28] sm:$0xff] }
  0x67   : > { %1669 = vmatprep.mubr.f32.mxu1 %v495_v10  ;;  %1801 = vmatprep.mubr.f32.mxu0 %v493_v30  ;;  %v545_v10 = vand.u32 4294901760, %v544_v26  ;;  %v598_v30 = vand.u32 4294901760, %v597_v49 }
  0x68   : > { %1670 = vmatmul.mubr.f32.gmra.mrb[2].mxu1 %v505_v33  ;;  %1802 = vmatmul.mubr.f32.gmra.mrb[2].mxu0 %v503_v35  ;;  %v610_v35 = vand.u32 4294901760, %v2418_v59  ;;  %v1340_v33 = vld [vmem:[%s2759_s3] sm:$0xff] }
  0x69   : > { %1672 = vmatprep.mubr.f32.mxu1 %v515_v21  ;;  %1804 = vmatprep.mubr.f32.mxu0 %v513_v50  ;;  %v617_v50 = vand.u32 4294901760, %v2420_v60  ;;  %v1942_v27 = vpack.c.bf16 %v605_v12, %v598_v30  ;;  %v1343_v30 = vld [vmem:[%s2759_s3 + $0x18] sm:$0xff] }
  0x6a   : > { %v611_v39 = vsub.f32 %v2418_v59, %v610_v35  ;;  %v276_v12 = vld [vmem:[%s2758_s2 + $0x38] sm:$0xff] }
  0x6b   : > { %v618_v55 = vsub.f32 %v2420_v60, %v617_v50  ;;  %v624_v60 = vand.u32 4294901760, %v2442_v6  ;;  %v2042_v4 = vpack.c.bf16 %v617_v50, %v610_v35 }
  0x6c   : > { %1673 = vmatmul.mubr.f32.gmra.mrb[4].mxu1 %v525_v51  ;;  %1805 = vmatmul.mubr.f32.gmra.mrb[4].mxu0 %v523_v9  ;;  %v272_v9 = vld [vmem:[%s2758_s2 + $0x18] sm:$0xff]  ;;  %v612_v59 = vand.u32 4294901760, %v611_v39 }
  0x6d   : > { %1937 = vmatpush3.bf16.xpose.msra.mxu1 %v1934_v28  ;;  %2033 = vmatpush3.bf16.xpose.msra.mxu0 %v2030_v34  ;;  %v2038_v34 = vpack.c.bf16 %v603_v53, %v596_v52  ;;  %v619_v25 = vand.u32 4294901760, %v618_v55  ;;  %v631_v28 = vand.u32 4294901760, %v2444_v7  ;;  %v625_v5 = vsub.f32 %v2442_v6, %v624_v60  ;;  %v1341_v53 = vld [vmem:[%s2759_s3 + $0x8] sm:$0xff] }
  0x6e   : > { %1939 = vmatprep.subr.bf16.mxu1 %v1938_v22  ;;  %2035 = vmatprep.subr.bf16.mxu0 %v2034_v24  ;;  %v638_v6 = vand.u32 4294901760, %v2463_v17 }
  0x6f   : > { %1675 = vmatprep.mubr.f32.mxu1 %v535_v48  ;;  %1807 = vmatprep.mubr.f32.mxu0 %v533_v15  ;;  %v273_v15 = vld [vmem:[%s2758_s2 + $0x20] sm:$0xff]  ;;  %v1946_v21 = vpack.c.bf16 %v619_v25, %v612_v59  ;;  %v632_v52 = vsub.f32 %v2444_v7, %v631_v28  ;;  %v626_v51 = vand.u32 4294901760, %v625_v5  ;;  %v645_v7 = vand.u32 4294901760, %v2465_v18 }
  0x70   : > { %1676 = vmatmul.mubr.f32.gmra.mrb[6].mxu1 %v545_v10  ;;  %1808 = vmatmul.mubr.f32.gmra.mrb[6].mxu0 %v543_v23  ;;  %v270_v23 = vld [vmem:[%s2758_s2 + $0x8] sm:$0xff]  ;;  %v2046_v13 = vpack.c.bf16 %v631_v28, %v624_v60  ;;  %v639_v48 = vsub.f32 %v2463_v17, %v638_v6  ;;  %v652_v17 = vand.u32 4294901760, %v2501_v41 }
  0x71   : > { %1710 = vmatprep.mubr.f32.mxu1 %v2331_v2  ;;  %1842 = vmatprep.mubr.f32.mxu0 %v2331_v2  ;;  %v633_v26 = vand.u32 4294901760, %v632_v52  ;;  %v646_v10 = vsub.f32 %v2465_v18, %v645_v7  ;;  %v659_v18 = vand.u32 4294901760, %v2503_v42 }
  0x72   : > { %284 = vperm.xlu0 %2178, %v270_v23   ;;  %294 = vperm.xlu1 %2179, %v272_v9   ;;  %v640_v35 = vand.u32 4294901760, %v639_v48  ;;  %v653_v39 = vsub.f32 %v2501_v41, %v652_v17  ;;  %v1347_v23 = vld [vmem:[%s2759_s3 + $0x38] sm:$0xff] }
  0x73   : > { %v1950_v49 = vpack.c.bf16 %v633_v26, %v626_v51  ;;  %v647_v50 = vand.u32 4294901760, %v646_v10  ;;  %v660_v55 = vsub.f32 %v2503_v42, %v659_v18  ;;  %v2054_v42 = vpack.c.bf16 %v659_v18, %v652_v17 }
  0x74   : > { %v654_v9 = vand.u32 4294901760, %v653_v39 }
  0x75   : > { %1941 = vmatpush3.bf16.xpose.msra.mxu1 %v1938_v22  ;;  %2037 = vmatpush3.bf16.xpose.msra.mxu0 %v2034_v24  ;;  %v1342_v22 = vld [vmem:[%s2759_s3 + $0x10] sm:$0xff]  ;;  %v661_v59 = vand.u32 4294901760, %v660_v55 }
  0x76   : > { %1943 = vmatprep.subr.bf16.mxu1 %v1942_v27  ;;  %2039 = vmatprep.subr.bf16.mxu0 %v2038_v34  ;;  %v275_v24 = vld [vmem:[%s2758_s2 + $0x30] sm:$0xff] }
  0x77   : > { %299 = vperm.xlu0 %2178, %v273_v15   ;;  %1350 = vperm.xlu1 %2179, %v1340_v33   ;;  %v1958_v41 = vpack.c.bf16 %v661_v59, %v654_v9 }
  0x7b   : > { %1355 = vperm.xlu0 %2178, %v1341_v53   ;;  %304 = vperm.xlu1 %2179, %v274_v11  }
  0x7d   : > { %1945 = vmatpush3.bf16.xpose.msra.mxu1 %v1942_v27  ;;  %2041 = vmatpush3.bf16.xpose.msra.mxu0 %v2038_v34  ;;  %v1954_v34 = vpack.c.bf16 %v647_v50, %v640_v35  ;;  %v2050_v27 = vpack.c.bf16 %v645_v7, %v638_v6 }
  0x7e   : > { %1947 = vmatprep.subr.bf16.mxu1 %v1946_v21  ;;  %2043 = vmatprep.subr.bf16.mxu0 %v2042_v4 }
  0x7f   : > { %1360 = vperm.xlu0 %2178, %v1342_v22   ;;  %309 = vperm.xlu1 %2179, %v275_v24  }
  0x83   : > { %1365 = vperm.xlu0 %2178, %v1343_v30   ;;  %314 = vperm.xlu1 %2179, %v276_v12  }
  0x85   : > { %1949 = vmatpush3.bf16.xpose.msra.mxu1 %v1946_v21  ;;  %2045 = vmatpush3.bf16.xpose.msra.mxu0 %v2042_v4 }
  0x86   : > { %1951 = vmatprep.subr.bf16.mxu1 %v1950_v49  ;;  %2047 = vmatprep.subr.bf16.mxu0 %v2046_v13 }
  0x87   : > { %1370 = vperm.xlu0 %2178, %v1344_v57   ;;  %1375 = vperm.xlu1 %2179, %v1345_v58  }
  0x8b   : > { %1380 = vperm.xlu0 %2178, %v1346_v56   ;;  %1385 = vperm.xlu1 %2179, %v1347_v23  }
  0x8d   : > { %1953 = vmatpush3.bf16.xpose.msra.mxu1 %v1950_v49  ;;  %2049 = vmatpush3.bf16.xpose.msra.mxu0 %v2046_v13 }
  0x8e   : > { %1955 = vmatprep.subr.bf16.mxu1 %v1954_v34  ;;  %2051 = vmatprep.subr.bf16.mxu0 %v2050_v27 }
  0x95   : > { %1957 = vmatpush3.bf16.xpose.msra.mxu1 %v1954_v34  ;;  %2053 = vmatpush3.bf16.xpose.msra.mxu0 %v2050_v27 }
  0x96   : > { %1959 = vmatprep.subr.bf16.mxu1 %v1958_v41  ;;  %2055 = vmatprep.subr.bf16.mxu0 %v2054_v42 }
  0x9d   : > { %1961 = vmatpush3.bf16.xpose.msra.mxu1 %v1958_v41  ;;  %2057 = vmatpush3.bf16.xpose.msra.mxu0 %v2054_v42 }
  0x9e   : > { %1963 = vmatprep.subr.bf16.mxu1 %v2410_v54  ;;  %2059 = vmatprep.subr.bf16.mxu0 %v2353_v19 }
  0xa4   : > { %1711 = vmatmul.mubr.f32.vlgmr.msra.gmra.mrb[0].mxu1 %v2487_v31  ;;  %1843 = vmatmul.mubr.f32.vlgmr.msra.gmra.mrb[0].mxu0 %v2487_v31 }
  0xa5   : > { %1965 = vmatpush3.bf16.xpose.msra.mxu1 %v2410_v54  ;;  %2061 = vmatpush3.bf16.xpose.msra.mxu0 %v2353_v19  ;;  %v2782_v19 = vld [vmem:[#allocation10_spill] sm:$0xff] }
  0xa6   : > { %1967 = vmatprep.subr.bf16.mxu1 %v2424_v61  ;;  %2063 = vmatprep.subr.bf16.mxu0 %v2355_v20 }
  0xa7   : > { %1713 = vmatprep.mubr.f32.mxu1 %v2499_v40  ;;  %1845 = vmatprep.mubr.f32.mxu0 %v2499_v40 }
  0xa8   : > { %1714 = vmatmul.mubr.f32.gmra.mrb[2].mxu1 %v2508_v45  ;;  %1846 = vmatmul.mubr.f32.gmra.mrb[2].mxu0 %v2508_v45 }
  0xa9   : > { %1716 = vmatprep.mubr.f32.mxu1 %v2512_v46  ;;  %1848 = vmatprep.mubr.f32.mxu0 %v2512_v46 }
  0xac   : > { %1717 = vmatmul.mubr.f32.gmra.mrb[4].mxu1 %v2536_v14  ;;  %1849 = vmatmul.mubr.f32.gmra.mrb[4].mxu0 %v2536_v14 }
  0xad   : > { %1969 = vmatpush3.bf16.xpose.msra.mxu1 %v2424_v61  ;;  %2065 = vmatpush3.bf16.xpose.msra.mxu0 %v2355_v20  ;;  %v2783_v20 = vld [vmem:[#allocation8_spill] sm:$0xff] }
  0xae   : > { %1971 = vmatprep.subr.bf16.mxu1 %v2428_v62  ;;  %2067 = vmatprep.subr.bf16.mxu0 %v2368_v29 }
  0xaf   : > { %1719 = vmatprep.mubr.f32.mxu1 %v2546_v32  ;;  %1851 = vmatprep.mubr.f32.mxu0 %v2546_v32 }
  0xb0   : > { %1720 = vmatmul.mubr.f32.gmra.mrb[6].mxu1 %v2553_v38  ;;  %1852 = vmatmul.mubr.f32.gmra.mrb[6].mxu0 %v2553_v38 }
  0xb1   : > { %1754 = vmatprep.mubr.f32.mxu1 %v2335_v3  ;;  %1886 = vmatprep.mubr.f32.mxu0 %v2331_v2  ;;  %v2780_v2 = vld [vmem:[#allocation7_spill] sm:$0xff]  ;;  %v2781_v3 = vld [vmem:[#allocation6_spill] sm:$0xff] }
  0xb5   : > { %1973 = vmatpush3.bf16.xpose.msra.mxu1 %v2428_v62  ;;  %2069 = vmatpush3.bf16.xpose.msra.mxu0 %v2368_v29  ;;  %v2784_v29 = vld [vmem:[#allocation9_spill] sm:$0xff] }
  0xb6   : > { %1975 = vmatprep.subr.bf16.mxu1 %v2434_v0  ;;  %2071 = vmatprep.subr.bf16.mxu0 %v2378_v36 }
  0xbd   : > { %1977 = vmatpush3.bf16.xpose.msra.mxu1 %v2434_v0  ;;  %2073 = vmatpush3.bf16.xpose.msra.mxu0 %v2378_v36  ;;  %v2785_v36 = vld [vmem:[#allocation11_spill] sm:$0xff] }
  0xbe   : > { %1979 = vmatprep.subr.bf16.mxu1 %v2438_v1  ;;  %2075 = vmatprep.subr.bf16.mxu0 %v2388_v43 }
  0xc5   : > { %1981 = vmatpush3.bf16.xpose.msra.mxu1 %v2438_v1  ;;  %2077 = vmatpush3.bf16.xpose.msra.mxu0 %v2388_v43  ;;  %v2786_v43 = vld [vmem:[#allocation12_spill] sm:$0xff] }
  0xc6   : > { %1983 = vmatprep.subr.bf16.mxu1 %v2450_v8  ;;  %2079 = vmatprep.subr.bf16.mxu0 %v2430_v63 }
  0xcd   : > { %1985 = vmatpush3.bf16.xpose.msra.mxu1 %v2450_v8  ;;  %2081 = vmatpush3.bf16.xpose.msra.mxu0 %v2430_v63 }
  0xce   : > { %1987 = vmatprep.subr.bf16.mxu1 %v2780_v2  ;;  %2083 = vmatprep.subr.bf16.mxu0 %v2781_v3 }
  0xd5   : > { %1989 = vmatpush3.bf16.xpose.msra.mxu1 %v2780_v2  ;;  %2085 = vmatpush3.bf16.xpose.msra.mxu0 %v2781_v3 }
  0xd6   : > { %1991 = vmatprep.subr.bf16.mxu1 %v2782_v19  ;;  %2087 = vmatprep.subr.bf16.mxu0 %v2783_v20 }
  0xdd   : > { %1993 = vmatpush3.bf16.xpose.msra.mxu1 %v2782_v19  ;;  %2089 = vmatpush3.bf16.xpose.msra.mxu0 %v2783_v20 }
  0xde   : > { %v280_v54 = vpop.permute.xlu0 %279  ;;  %v290_v61 = vpop.permute.xlu1 %289 }
  0xe4   : > { %1755 = vmatmul.mubr.f32.vlgmr.msra.gmra.mrb[0].mxu1 %v2784_v29  ;;  %1887 = vmatmul.mubr.f32.vlgmr.msra.gmra.mrb[0].mxu0 %v2487_v31 }
  0xe5   : > { %1757 = vmatprep.mubr.f32.mxu1 %v2785_v36  ;;  %1889 = vmatprep.mubr.f32.mxu0 %v2499_v40 }
  0xe8   : > { %1758 = vmatmul.mubr.f32.gmra.mrb[2].mxu1 %v2786_v43  ;;  %1890 = vmatmul.mubr.f32.gmra.mrb[2].mxu0 %v2508_v45 }
  0xe9   : > { %1760 = vmatprep.mubr.f32.mxu1 %v2540_v16  ;;  %1892 = vmatprep.mubr.f32.mxu0 %v2512_v46 }
  0xec   : > { %1761 = vmatmul.mubr.f32.gmra.mrb[4].mxu1 %v2551_v37  ;;  %1893 = vmatmul.mubr.f32.gmra.mrb[4].mxu0 %v2536_v14 }
  0xed   : > { %1763 = vmatprep.mubr.f32.mxu1 %v2562_v47  ;;  %1895 = vmatprep.mubr.f32.mxu0 %v2546_v32 }
  0xf0   : > { %1764 = vmatmul.mubr.f32.gmra.mrb[6].mxu1 %v2567_v44  ;;  %1896 = vmatmul.mubr.f32.gmra.mrb[6].mxu0 %v2553_v38 }
  0xf1   : > { %v285_v62 = vpop.permute.xlu0 %284  ;;  %v295_v63 = vpop.permute.xlu1 %294 }
  0xf6   : > { %v300_v0 = vpop.permute.xlu0 %299  ;;  %v1351_v1 = vpop.permute.xlu1 %1350 }
  0xfa   : > { %v1356_v8 = vpop.permute.xlu0 %1355  ;;  %v305_v31 = vpop.permute.xlu1 %304 }
  0xfe   : > { %v1361_v40 = vpop.permute.xlu0 %1360  ;;  %v310_v45 = vpop.permute.xlu1 %309 }
 0x102   : > { %v1366_v25 = vpop.permute.xlu0 %1365  ;;  %v315_v53 = vpop.permute.xlu1 %314 }
 0x106   : > { %v1371_v35 = vpop.permute.xlu0 %1370  ;;  %v1376_v41 = vpop.permute.xlu1 %1375 }
 0x1b7   : > { %v1756_v46 = vpop.f32.mrb[0].mxu1  ;;  %v1888_v14 = vpop.f32.mrb[0].mxu0 }
 0x1b8   : > { %v2090_v16 = vadd.f32 %v1756_v46, %v285_v62  ;;  %v844_v37 = vpop.f32.mrb[1].mxu1  ;;  %v1286_v47 = vpop.f32.mrb[1].mxu0 }
 0x1b9   : > { %v2092_v32 = vadd.f32 %v844_v37, %v280_v54  ;;  %v1381_v54 = vpop.permute.xlu0 %1380 }
 0x1ba   : > { %v2091_v44 = vadd.f32 %v2090_v16, %v1888_v14  ;;  %v1410_v16 = vstv %s1409_s9 }
 0x1bb   : > { %v2093_v60 = vadd.f32 %v2092_v32, %v1286_v47  ;;  %v1759_v38 = vpop.f32.mrb[2].mxu1  ;;  %v1891_v28 = vpop.f32.mrb[2].mxu0 }
 0x1bc   : > { %v1333_v15 = vmax.f32 %v2091_v44, 0.0  ;;  %v2094_v33 = vadd.f32 %v1759_v38, %v295_v63  ;;  %v858_v21 = vpop.f32.mrb[3].mxu1  ;;  %v1298_v4 = vpop.f32.mrb[3].mxu0 }
 0x1bd   : > { %v1332_v5 = vmax.f32 %v2093_v60, 0.0  ;;  %v2096_v52 = vadd.f32 %v858_v21, %v290_v61  ;;  %v1386_v63 = vpop.permute.xlu1 %1385 }
 0x1be   : > { %v1389_v11 = vmul.f32 %v1356_v8, %v1333_v15  ;;  %v2095_v51 = vadd.f32 %v2094_v33, %v1891_v28 }
 0x1bf   : > { %v1388_v26 = vmul.f32 %v1351_v1, %v1332_v5  ;;  %v2097_v6 = vadd.f32 %v2096_v52, %v1298_v4  ;;  %v1762_v7 = vpop.f32.mrb[4].mxu1  ;;  %v1894_v22 = vpop.f32.mrb[4].mxu0 }
 0x1c0   : > { %v1335_v24 = vmax.f32 %v2095_v51, 0.0  ;;  %v2098_v49 = vadd.f32 %v1762_v7, %v305_v31  ;;  %v872_v13 = vpop.f32.mrb[5].mxu1  ;;  %v1310_v48 = vpop.f32.mrb[5].mxu0 }
 0x1c1   : > { %v1396_v10 = vadd.f32 %v1389_v11, %v1388_v26  ;;  %v1334_v30 = vmax.f32 %v2097_v6, 0.0  ;;  %v2100_v12 = vadd.f32 %v872_v13, %v300_v0 }
 0x1c2   : > { %v2099_v50 = vadd.f32 %v2098_v49, %v1894_v22  ;;  %v1391_v34 = vmul.f32 %v1366_v25, %v1335_v24 }
 0x1c3   : > { %v1390_v17 = vmul.f32 %v1361_v40, %v1334_v30  ;;  %v2101_v18 = vadd.f32 %v2100_v12, %v1310_v48  ;;  %v1765_v57 = vpop.f32.mrb[6].mxu1  ;;  %v1897_v58 = vpop.f32.mrb[6].mxu0 }
 0x1c4   : > { %v2102_v27 = vadd.f32 %v1765_v57, %v315_v53  ;;  %v886_v39 = vpop.f32.mrb[7].mxu1  ;;  %v1322_v55 = vpop.f32.mrb[7].mxu0  ;;  %v1337_v23 = vmax.f32 %v2099_v50, 0.0 }
 0x1c5   : > { %v1397_v56 = vadd.f32 %v1396_v10, %v1390_v17  ;;  %v1336_v9 = vmax.f32 %v2101_v18, 0.0  ;;  %v2104_v59 = vadd.f32 %v886_v39, %v310_v45 }
 0x1c6   : > { %v2103_v42 = vadd.f32 %v2102_v27, %v1897_v58  ;;  %v1393_v20 = vmul.f32 %v1376_v41, %v1337_v23 }
 0x1c7   : > { %v1392_v2 = vmul.f32 %v1371_v35, %v1336_v9  ;;  %v1398_v3 = vadd.f32 %v1397_v56, %v1391_v34  ;;  %v2105_v19 = vadd.f32 %v2104_v59, %v1322_v55 }
 0x1c8   : > { %v1339_v36 = vmax.f32 %v2103_v42, 0.0 }
 0x1c9   : > { %v1399_v29 = vadd.f32 %v1398_v3, %v1392_v2  ;;  %v1338_v43 = vmax.f32 %v2105_v19, 0.0 }
 0x1ca   : > { %v1395_v0 = vmul.f32 %v1386_v63, %v1339_v36 }
 0x1cb   : > { %v1394_v61 = vmul.f32 %v1381_v54, %v1338_v43  ;;  %v1400_v62 = vadd.f32 %v1399_v29, %v1393_v20 }
 0x1cd   : > { %v1401_v1 = vadd.f32 %v1400_v62, %v1394_v61 }
 0x1cf   : > { %v1402_v8 = vadd.f32 %v1401_v1, %v1395_v0 }
 0x1d1   : > { %v1403_v31 = vrot.slane %v1402_v8, 4 }
 0x1d3   : > { %v1404_v40 = vadd.f32 %v1403_v31, %v1402_v8 }
 0x1d5   : > { %v1405_v45 = vrot.slane %v1404_v40, 2 }
 0x1d7   : > { %v1406_v46 = vadd.f32 %v1405_v45, %v1404_v40 }
 0x1d9   : > { %v1407_v14 = vrot.slane %v1406_v46, 1 }
 0x1db   : > { %v1408_v37 = vadd.f32 %v1407_v14, %v1406_v46 }
 0x1dd   : > { %v1411_v47 = vadd.f32 %v1410_v16, %v1408_v37 }
 0x1df   : > { %1412 = vst [vmem:[%s230_s11] sm:$0x1] %v1411_v47 }
 0x1e0   : > { %2193 = shalt.err (!%p2190_p3)
}
 0x1e1   : > { %s2194_s6 = scalar_lea.hbm %s2714_s15, 16  ;;  %s2198_s27 = scalar_lea.hbm %s2761_s5, 32 }
 0x1e2   : > { %p2195_p4 = scmp.ne.s32.totalorder %s2714_s15, %s2194_s6  ;;  %p2199_p9 = scmp.lt.u32.totalorder %s2714_s15, %s2761_s5 }
 0x1e3   : > { %p2200_p10 = scmp.lt.u32.totalorder %s2198_s27, %s2194_s6  ;;  %p2202_p12 = scmp.lt.u32.totalorder %s2194_s6, %s2714_s15 }
 0x1e4   : > { %p2196_p7 = pnand %p2195_p4, %p2314_p5 }
 0x1e5   : > { %p2201_p11 = por %p2200_p10, %p2199_p9 }
 0x1e6   : > { %p2197_p8 = pneg %p2196_p7 }
 0x1e7   : > { %p2203_p13 = por %p2202_p12, %p2201_p11 }
 0x1e9   : > { %p2204_p0 = pnand %p2203_p13, %p2197_p8 }
 0x1eb   : > { %2207 = shalt.err (!%p2204_p0)
}
 0x1ec   : > { %2138 = dma.vmem_to_hbm [thread:$0]  (%p2314_p5), %s2716_s12, 16, %s2714_s15, %s1414_s16  }
 0x1ed PF: > { %p2144_p1 = scmp.ge.s32.totalorder %s2242_s23, 2  ;;  %s1438_s9 = sand.u32 1, %s2230_s20  }
 0x1ee   : > { %s1439_s10 = scalar_lea.sflag [#allocation4], %s1438_s9 }
 0x1ef   : > { %p2141_p2 = pnand %p2144_p1, %p2318_p6 }
 0x1f1   : > { %2225 = dma.done.wait (!%p2141_p2), %s1439_s10, 16  }
 0x1f2   : > { %2227 = vsyncadd (!%p2141_p2), %s1439_s10, 4294967280  ;;  %p16_p3 = scmp.ge.s32.totalorder %s2302_s25, 4   ;;  %s2787_s20 = smov %s2234_s21 }
 0x1f3   : > { %s2788_s21 = smov %s2238_s22  ;;  %s2789_s22 = smov %s2312_s28 }
 0x1f4   : > { %s2790_s23 = smov %s2302_s25  ;;  %18 = sbr.rel (!%p16_p3) target bundleno = 5 (0x5), region = 75 }
 0x1fb   :  { %1443 = vsyncpa [#allocation4], 1 }
 0x1fc   :  { %1445 = vsyncpa [#allocation4 + $0x1], 1 }

</bundles_post_ra>
